<compile_context>
chip_gen: v6e
topology: v6e:2x2x1
jax: 0.10.0
libtpu: 0.0.40
codegen_flags: <defaults>
</compile_context>

<pallas_src>
import functools

import jax
import jax.numpy as jnp
from jax.experimental import pallas as pl
from jax.experimental.pallas import tpu as pltpu


MAX_TILE_N = 1024   # beyond ~1024 lanes the (H, tile) f32 intermediates spill vregs


def _step(x):
    # smooth step function used by ExpHydro hybrid models
    return 0.5 * (jnp.tanh(5.0 * x) + 1.0)


# ---------------------------------------------------------------------------
# Shared in-kernel math (lane-major: the batch/time dim N lives on lanes).
# ---------------------------------------------------------------------------
def _exphydro_rhs_rows(s0, s1, neg_temp, lday, x_aug, w1a, w2, b2, w3, b3):
    """ExpHydro RHS for lane-major rows.

    s0/s1/neg_temp: (1, N); lday: (1, N) row or scalar;
    x_aug: (5, N) rows [s0, s1, precp, temp, 1] (layer-1 bias folded via ones row);
    w1a: (H, 5) = [W1^T | b1]; w2: (H, H); b2: (H, 1); w3: (5, H); b3: (5, 1).
    Returns (2, N) = [ds0/dt ; ds1/dt].
    """
    # --- MLP ("pretrainer.nnmodel", 4 -> H -> H -> 5) as W @ x on the MXU ---
    h1 = jnp.tanh(jnp.dot(w1a, x_aug, preferred_element_type=jnp.float32))   # (H, N)
    h2 = jnp.tanh(jnp.dot(w2, h1, preferred_element_type=jnp.float32) + b2)  # (H, N)
    m100 = jnp.dot(w3, h2, preferred_element_type=jnp.float32) + b3          # (5, N)

    # --- scale_target_vars=True epilogue, transcendentals batched on the EUP ---
    # sinh(x) = 0.5*(e^x - e^-x): one (5,N) exp + one (3,N) exp replace
    # 3x sinh + 2x exp on (1,N) slices.
    e_pos = jnp.exp(m100)                    # rows: p_snow, p_rain, m, et, q
    e_neg = jnp.exp(-m100[0:3, :])
    sinh3 = 0.5 * (e_pos[0:3, :] - e_neg)    # sinh(p_snow), sinh(p_rain), sinh(m)

    # step(x) = 0.5*(tanh(5x)+1): one (3,N) tanh for step(-temp), step(s0), step(s1)
    steps = 0.5 * (jnp.tanh(5.0 * jnp.concatenate([neg_temp, s0, s1], axis=0)) + 1.0)
    step_neg_temp = steps[0:1, :]
    step_s0 = steps[1:2, :]
    step_s1 = steps[2:3, :]                  # hoisted; reused for both et and q

    p_snow = jnp.maximum(sinh3[0:1, :] * step_neg_temp, 0.0)
    p_rain = jnp.maximum(sinh3[1:2, :], 0.0)
    m = jnp.maximum(step_s0 * sinh3[2:3, :], 0.0)
    et = step_s1 * e_pos[3:4, :] * lday
    q = step_s1 * e_pos[4:5, :]

    ds0 = p_snow - m
    ds1 = p_rain + m - et - q
    return jnp.concatenate([ds0, ds1], axis=0)   # (2, N)


# ---------------------------------------------------------------------------
# Kernel 1: batched RHS evaluation (one forward pass of the module over N points)
# ---------------------------------------------------------------------------
def exphydro_rhs_kernel(x_ref, w1a_ref, w2_ref, b2_ref, w3_ref, b3_ref, out_ref):
    # x rows: 0:s0  1:s1  2:precp  3:temp  4:ones  5:lday        (6, TILE_N)
    x = x_ref[...]
    out_ref[...] = _exphydro_rhs_rows(
        s0=x[0:1, :], s1=x[1:2, :], neg_temp=-x[3:4, :], lday=x[5:6, :],
        x_aug=x[0:5, :],
        w1a=w1a_ref[...], w2=w2_ref[...], b2=b2_ref[...],
        w3=w3_ref[...], b3=b3_ref[...])


# ---------------------------------------------------------------------------
# Kernel 2: fused forward-Euler integrator (time loop inside one pallas_call)
# ---------------------------------------------------------------------------
def exphydro_euler_kernel(precp_s, temp_s, lday_s,            # SMEM (T,) forcing
                          y0_ref, w1a_ref, w2_ref, b2_ref, w3_ref, b3_ref,
                          yT_ref, *, n_steps, dt):
    # Weights loaded once; resident across the whole time loop.
    w1a = w1a_ref[...]
    w2 = w2_ref[...]
    b2 = b2_ref[...]
    w3 = w3_ref[...]
    b3 = b3_ref[...]
    ones = jnp.ones_like(y0_ref[0:1, :])                       # (1, N)

    def body(k, y):                                            # y: (2, N) state
        precp_k = precp_s[k]
        temp_k = temp_s[k]
        lday_k = lday_s[k]
        x_aug = jnp.concatenate(
            [y, ones * precp_k, ones * temp_k, ones], axis=0)  # (5, N)
        ds = _exphydro_rhs_rows(
            s0=y[0:1, :], s1=y[1:2, :], neg_temp=ones * (-temp_k), lday=lday_k,
            x_aug=x_aug, w1a=w1a, w2=w2, b2=b2, w3=w3, b3=b3)
        return y + dt * ds

    yT_ref[...] = jax.lax.fori_loop(0, n_steps, body, y0_ref[...])


# ---------------------------------------------------------------------------
# Wrappers
# ---------------------------------------------------------------------------
def _prep_weights(w1, b1, w2, b2, w3, b3):
    """Transpose to the W @ x orientation; fold layer-1 bias into the weight."""
    w1a = jnp.concatenate([w1.T, b1[:, None]], axis=1).astype(jnp.float32)  # (H, 5)
    w2t = w2.T.astype(jnp.float32)                                          # (H, H)
    b2c = b2[:, None].astype(jnp.float32)                                   # (H, 1)
    w3t = w3.T.astype(jnp.float32)                                          # (5, H)
    b3c = b3[:, None].astype(jnp.float32)                                   # (5, 1)
    return w1a, w2t, b2c, w3t, b3c


def _choose_tile(n_pad, max_tile):
    if n_pad <= max_tile:
        return n_pad                       # single grid step
    for cand in range(max_tile, 0, -128):  # largest multiple-of-128 divisor <= cap
        if n_pad % cand == 0:
            return cand
    return 128


@functools.partial(jax.jit, static_argnames=("max_tile",))
def exphydro_ode_rhs_stacked(x, w1a, w2t, b2c, w3t, b3c, *, max_tile=MAX_TILE_N):
    """Lane-major RHS: x (6, N_pad) rows [s0, s1, precp, temp, ones, lday],
    N_pad a multiple of 128.  Returns (2, N_pad).  Call this directly from an
    integrator to avoid per-call stack/pad/transpose glue."""
    _, n_pad = x.shape
    if n_pad % 128 != 0:
        raise ValueError("N_pad must be a multiple of 128")
    h = w2t.shape[0]
    tile = _choose_tile(n_pad, max_tile)
    return pl.pallas_call(
        exphydro_rhs_kernel,
        out_shape=jax.ShapeDtypeStruct((2, n_pad), jnp.float32),
        grid_spec=pltpu.PrefetchScalarGridSpec(
            num_scalar_prefetch=0,
            grid=(n_pad // tile,),
            in_specs=[
                pl.BlockSpec((6, tile), lambda j: (0, j)),   # stacked inputs
                pl.BlockSpec((h, 5), lambda j: (0, 0)),      # [W1^T | b1] (resident)
                pl.BlockSpec((h, h), lambda j: (0, 0)),      # W2^T
                pl.BlockSpec((h, 1), lambda j: (0, 0)),      # b2
                pl.BlockSpec((5, h), lambda j: (0, 0)),      # W3^T
                pl.BlockSpec((5, 1), lambda j: (0, 0)),      # b3
            ],
            out_specs=pl.BlockSpec((2, tile), lambda j: (0, j)),
        ),
        compiler_params=pltpu.CompilerParams(
            dimension_semantics=("parallel",)),              # both TCs on v7x
    )(x, w1a, w2t, b2c, w3t, b3c)


def exphydro_ode_rhs(y, precp, temp, lday, w1, b1, w2, b2, w3, b3,
                     *, max_tile=MAX_TILE_N):
    """(N, 2)-layout convenience wrapper matching the PyTorch module's forward.

    NOTE: when driven repeatedly from a solver, prefer exphydro_ode_rhs_stacked
    (or exphydro_euler_integrate) — the stack/pad/transpose below cost roughly
    as much as the kernel at this problem size.
    """
    n = y.shape[0]
    n_pad = pl.cdiv(n, 128) * 128
    ones = jnp.ones((n,), jnp.float32)
    x = jnp.stack([y[:, 0], y[:, 1], precp, temp, ones, lday], axis=0)
    x = jnp.pad(x.astype(jnp.float32), ((0, 0), (0, n_pad - n)))
    params = _prep_weights(w1, b1, w2, b2, w3, b3)
    out_t = exphydro_ode_rhs_stacked(x, *params, max_tile=max_tile)
    return out_t[:, :n].T


@functools.partial(jax.jit, static_argnames=("dt",))
def exphydro_euler_integrate(y0, precp_steps, temp_steps, lday_steps,
                             w1, b1, w2, b2, w3, b3, *, dt):
    """Forward-Euler integration of the ExpHydro ODEs fused into ONE pallas_call:
    the time loop runs inside the kernel with weights held resident, eliminating
    per-RHS dispatch and XLA glue.

    y0: (N, 2); *_steps: (T,) per-step forcing values precp(t_k)/temp(t_k)/lday(t_k).
    Returns the state after T Euler steps, shape (N, 2).
    """
    # TODO(synk): higher-order solvers (RK stages) fuse the same way — evaluate
    # all stages inside the fori_loop body with the same resident weights.
    n = y0.shape[0]
    n_steps = int(precp_steps.shape[0])
    n_pad = pl.cdiv(n, 128) * 128
    h = w2.shape[0]
    y0_t = jnp.pad(y0.T.astype(jnp.float32), ((0, 0), (0, n_pad - n)))   # (2, N_pad)
    w1a, w2t, b2c, w3t, b3c = _prep_weights(w1, b1, w2, b2, w3, b3)
    kernel = functools.partial(exphydro_euler_kernel, n_steps=n_steps, dt=float(dt))
    yT = pl.pallas_call(
        kernel,
        out_shape=jax.ShapeDtypeStruct((2, n_pad), jnp.float32),
        grid_spec=pltpu.PrefetchScalarGridSpec(
            num_scalar_prefetch=3,            # forcing tables -> SMEM scalar reads
            grid=(1,),
            in_specs=[
                pl.BlockSpec((2, n_pad), lambda i, p, t, l: (0, 0)),
                pl.BlockSpec((h, 5), lambda i, p, t, l: (0, 0)),
                pl.BlockSpec((h, h), lambda i, p, t, l: (0, 0)),
                pl.BlockSpec((h, 1), lambda i, p, t, l: (0, 0)),
                pl.BlockSpec((5, h), lambda i, p, t, l: (0, 0)),
                pl.BlockSpec((5, 1), lambda i, p, t, l: (0, 0)),
            ],
            out_specs=pl.BlockSpec((2, n_pad), lambda i, p, t, l: (0, 0)),
        ),
        compiler_params=pltpu.CompilerParams(
            dimension_semantics=("arbitrary",)),
    )(precp_steps.astype(jnp.float32), temp_steps.astype(jnp.float32),
      lday_steps.astype(jnp.float32), y0_t, w1a, w2t, b2c, w3t, b3c)
    return yT[:, :n].T


# ---------------------------------------------------------------------------
# Plain-JAX references (validation) + forcing glue
# ---------------------------------------------------------------------------
def exphydro_ode_rhs_reference(y, precp, temp, lday, w1, b1, w2, b2, w3, b3):
    s0 = y[:, 0:1]
    s1 = y[:, 1:2]
    precp = precp[:, None]
    temp = temp[:, None]
    lday = lday[:, None]
    hp = jax.lax.Precision.HIGHEST
    x = jnp.concatenate([s0, s1, precp, temp], axis=-1)
    h1 = jnp.tanh(jnp.dot(x, w1, precision=hp) + b1)
    h2 = jnp.tanh(jnp.dot(h1, w2, precision=hp) + b2)
    m100 = jnp.dot(h2, w3, precision=hp) + b3
    p_snow, p_rain, m, et, q = [m100[:, i:i + 1] for i in range(5)]
    p_snow = jnp.maximum(jnp.sinh(p_snow) * _step(-temp), 0.0)
    p_rain = jnp.maximum(jnp.sinh(p_rain), 0.0)
    m = jnp.maximum(_step(s0) * jnp.sinh(m), 0.0)
    et = _step(s1) * jnp.exp(et) * lday
    q = _step(s1) * jnp.exp(q)
    return jnp.concatenate([p_snow - m, p_rain + m - et - q], axis=-1)


def exphydro_euler_reference(y0, precp_steps, temp_steps, lday_steps, dt,
                             w1, b1, w2, b2, w3, b3):
    n = y0.shape[0]
    y = y0
    for k in range(int(precp_steps.shape[0])):
        pr = jnp.full((n,), precp_steps[k])
        te = jnp.full((n,), temp_steps[k])
        ld = jnp.full((n,), lday_steps[k])
        y = y + dt * exphydro_ode_rhs_reference(y, pr, te, ld, w1, b1, w2, b2, w3, b3)
    return y


def periodic_linear_interp(table, t):
    """Glue: periodic ('extrapolate=periodic') linear interpolation in plain JAX."""
    period = table.shape[0]
    tp = jnp.mod(t, period)
    i0 = jnp.floor(tp).astype(jnp.int32)
    i1 = jnp.mod(i0 + 1, period)
    frac = tp - i0.astype(tp.dtype)
    return table[i0] * (1.0 - frac) + table[i1] * frac


if __name__ == "__main__":
    key = jax.random.PRNGKey(0)
    keys = jax.random.split(key, 10)

    N = 512        # batched points per RHS call -> single 512-lane grid step
    H = 32         # hidden width of the synthetic nnmodel
    T_TBL = 16     # length of synthetic forcing tables (periodic)

    # Synthetic forcing series (stand-ins for precp/temp/lday interpolators).
    precp_tbl = jax.random.uniform(keys[0], (T_TBL,), jnp.float32) * 10.0
    temp_tbl = jax.random.uniform(keys[1], (T_TBL,), jnp.float32) * 30.0 - 10.0
    lday_tbl = jax.random.uniform(keys[2], (T_TBL,), jnp.float32) * 0.2 + 0.3

    t = jnp.linspace(0.0, 365.0, N, dtype=jnp.float32)
    precp = periodic_linear_interp(precp_tbl, t)
    temp = periodic_linear_interp(temp_tbl, t)
    lday = periodic_linear_interp(lday_tbl, t)

    # State y = [s0 (snow store), s1 (water store)]
    y = (jax.random.uniform(keys[3], (N, 2), jnp.float32)
         * jnp.array([[100.0, 50.0]], jnp.float32))

    # Deterministic synthetic MLP parameters (4 -> H -> H -> 5), x@W+b form.
    # TODO(synk): the original pretrainer.nnmodel / basin bookkeeping is replaced
    # by this deterministic synthetic MLP of the same I/O signature.
    w1 = jax.random.normal(keys[4], (4, H), jnp.float32) * 0.5
    b1 = jnp.zeros((H,), jnp.float32)
    w2 = jax.random.normal(keys[5], (H, H), jnp.float32) * 0.3
    b2 = jnp.zeros((H,), jnp.float32)
    w3 = jax.random.normal(keys[6], (H, 5), jnp.float32) * 0.1
    b3 = jnp.zeros((5,), jnp.float32)

    # --- 1) batched RHS kernel (one forward pass of the module) ---
    out = exphydro_ode_rhs(y, precp, temp, lday, w1, b1, w2, b2, w3, b3)
    jax.block_until_ready(out)
    assert out.shape == (N, 2) and out.dtype == jnp.float32
    ref = exphydro_ode_rhs_reference(y, precp, temp, lday, w1, b1, w2, b2, w3, b3)
    assert bool(jnp.all(jnp.isfinite(out))), "non-finite RHS kernel output"
    rel_err = float(jnp.max(jnp.abs(out - ref) / (jnp.abs(ref) + 1.0)))
    assert rel_err < 1e-2, f"RHS mismatch vs reference: rel_err={rel_err}"

    # --- 2) fused forward-Euler integrator (time loop inside one pallas_call) ---
    n_steps = 16
    dt = 0.02
    t_steps = jnp.arange(n_steps, dtype=jnp.float32) * dt
    precp_s = periodic_linear_interp(precp_tbl, t_steps)
    temp_s = periodic_linear_interp(temp_tbl, t_steps)
    lday_s = periodic_linear_interp(lday_tbl, t_steps)
    y0 = (jax.random.uniform(keys[7], (N, 2), jnp.float32)
          * jnp.array([[10.0, 5.0]], jnp.float32))

    yT = exphydro_euler_integrate(y0, precp_s, temp_s, lday_s,
                                  w1, b1, w2, b2, w3, b3, dt=dt)
    jax.block_until_ready(yT)
    assert yT.shape == (N, 2) and yT.dtype == jnp.float32
    yT_ref = exphydro_euler_reference(y0, precp_s, temp_s, lday_s, dt,
                                      w1, b1, w2, b2, w3, b3)
    assert bool(jnp.all(jnp.isfinite(yT))), "non-finite Euler kernel output"
    rel_err2 = float(jnp.max(jnp.abs(yT - yT_ref) / (jnp.abs(yT_ref) + 1.0)))
    assert rel_err2 < 5e-2, f"Euler mismatch vs reference: rel_err={rel_err2}"

    print("KERNEL_OK")
</pallas_src>

<mosaic_0001>
module attributes {stable_mosaic.version = 11 : i64} {
  func.func @exphydro_rhs_kernel(%arg0: i32, %arg1: memref<6x512xf32, #tpu.memory_space<vmem>>, %arg2: memref<32x5xf32, #tpu.memory_space<vmem>>, %arg3: memref<32x32xf32, #tpu.memory_space<vmem>>, %arg4: memref<32x1xf32, #tpu.memory_space<vmem>>, %arg5: memref<5x32xf32, #tpu.memory_space<vmem>>, %arg6: memref<5x1xf32, #tpu.memory_space<vmem>>, %arg7: memref<2x512xf32, #tpu.memory_space<vmem>>) attributes {dimension_semantics = [#tpu.dimension_semantics<parallel>], iteration_bounds = array<i64: 1>, scalar_prefetch = 0 : i64, scratch_operands = 0 : i64, tpu.core_type = #tpu.core_type<tc>, window_params = [{transform_indices = @transform_0, window_bounds = array<i64: 6, 512>}, {pipeline_mode = #tpu.pipeline_mode<synchronous>, transform_indices = @transform_1, window_bounds = array<i64: 32, 5>}, {pipeline_mode = #tpu.pipeline_mode<synchronous>, transform_indices = @transform_2, window_bounds = array<i64: 32, 32>}, {pipeline_mode = #tpu.pipeline_mode<synchronous>, transform_indices = @transform_3, window_bounds = array<i64: 32, 1>}, {pipeline_mode = #tpu.pipeline_mode<synchronous>, transform_indices = @transform_4, window_bounds = array<i64: 5, 32>}, {pipeline_mode = #tpu.pipeline_mode<synchronous>, transform_indices = @transform_5, window_bounds = array<i64: 5, 1>}, {transform_indices = @transform_6, window_bounds = array<i64: 2, 512>}]} {
    %c0 = arith.constant 0 : index
    %c0_0 = arith.constant 0 : index
    %0 = vector.load %arg1[%c0, %c0_0] : memref<6x512xf32, #tpu.memory_space<vmem>>, vector<6x512xf32>
    %1 = vector.extract_strided_slice %0 {offsets = [0, 0], sizes = [1, 512], strides = [1, 1]} : vector<6x512xf32> to vector<1x512xf32>
    %2 = vector.extract_strided_slice %0 {offsets = [1, 0], sizes = [1, 512], strides = [1, 1]} : vector<6x512xf32> to vector<1x512xf32>
    %3 = vector.extract_strided_slice %0 {offsets = [3, 0], sizes = [1, 512], strides = [1, 1]} : vector<6x512xf32> to vector<1x512xf32>
    %cst = arith.constant 0.000000e+00 : f32
    %4 = vector.broadcast %cst : f32 to vector<1x512xf32>
    %5 = arith.subf %4, %3 : vector<1x512xf32>
    %6 = vector.extract_strided_slice %0 {offsets = [5, 0], sizes = [1, 512], strides = [1, 1]} : vector<6x512xf32> to vector<1x512xf32>
    %7 = vector.extract_strided_slice %0 {offsets = [0, 0], sizes = [5, 512], strides = [1, 1]} : vector<6x512xf32> to vector<5x512xf32>
    %c0_1 = arith.constant 0 : index
    %c0_2 = arith.constant 0 : index
    %8 = vector.load %arg2[%c0_1, %c0_2] : memref<32x5xf32, #tpu.memory_space<vmem>>, vector<32x5xf32>
    %c0_3 = arith.constant 0 : index
    %c0_4 = arith.constant 0 : index
    %9 = vector.load %arg3[%c0_3, %c0_4] : memref<32x32xf32, #tpu.memory_space<vmem>>, vector<32x32xf32>
    %c0_5 = arith.constant 0 : index
    %c0_6 = arith.constant 0 : index
    %10 = vector.load %arg4[%c0_5, %c0_6] : memref<32x1xf32, #tpu.memory_space<vmem>>, vector<32x1xf32>
    %c0_7 = arith.constant 0 : index
    %c0_8 = arith.constant 0 : index
    %11 = vector.load %arg5[%c0_7, %c0_8] : memref<5x32xf32, #tpu.memory_space<vmem>>, vector<5x32xf32>
    %c0_9 = arith.constant 0 : index
    %c0_10 = arith.constant 0 : index
    %12 = vector.load %arg6[%c0_9, %c0_10] : memref<5x1xf32, #tpu.memory_space<vmem>>, vector<5x1xf32>
    %cst_11 = arith.constant dense<0.000000e+00> : vector<32x512xf32>
    %13 = tpu.matmul %8, %7, %cst_11 {dimension_numbers = #tpu.dot_dimension_numbers<[1], [0], [0], [1], [0, 0, 1, 1], [], []>} : vector<32x5xf32>, vector<5x512xf32>, vector<32x512xf32> -> vector<32x512xf32>
    %14 = math.tanh %13 : vector<32x512xf32>
    %cst_12 = arith.constant dense<0.000000e+00> : vector<32x512xf32>
    %15 = tpu.matmul %9, %14, %cst_12 {dimension_numbers = #tpu.dot_dimension_numbers<[1], [0], [0], [1], [0, 0, 1, 1], [], []>} : vector<32x32xf32>, vector<32x512xf32>, vector<32x512xf32> -> vector<32x512xf32>
    %16 = vector.broadcast %10 : vector<32x1xf32> to vector<32x512xf32>
    %17 = arith.addf %15, %16 : vector<32x512xf32>
    %18 = math.tanh %17 : vector<32x512xf32>
    %cst_13 = arith.constant dense<0.000000e+00> : vector<5x512xf32>
    %19 = tpu.matmul %11, %18, %cst_13 {dimension_numbers = #tpu.dot_dimension_numbers<[1], [0], [0], [1], [0, 0, 1, 1], [], []>} : vector<5x32xf32>, vector<32x512xf32>, vector<5x512xf32> -> vector<5x512xf32>
    %20 = vector.broadcast %12 : vector<5x1xf32> to vector<5x512xf32>
    %21 = arith.addf %19, %20 : vector<5x512xf32>
    %22 = math.exp %21 : vector<5x512xf32>
    %23 = vector.extract_strided_slice %21 {offsets = [0, 0], sizes = [3, 512], strides = [1, 1]} : vector<5x512xf32> to vector<3x512xf32>
    %cst_14 = arith.constant 0.000000e+00 : f32
    %24 = vector.broadcast %cst_14 : f32 to vector<3x512xf32>
    %25 = arith.subf %24, %23 : vector<3x512xf32>
    %26 = math.exp %25 : vector<3x512xf32>
    %27 = vector.extract_strided_slice %22 {offsets = [0, 0], sizes = [3, 512], strides = [1, 1]} : vector<5x512xf32> to vector<3x512xf32>
    %28 = arith.subf %27, %26 : vector<3x512xf32>
    %cst_15 = arith.constant 5.000000e-01 : f32
    %29 = vector.broadcast %cst_15 : f32 to vector<3x512xf32>
    %30 = arith.mulf %29, %28 : vector<3x512xf32>
    %31 = tpu.concatenate %5, %1, %2 in 0 : vector<1x512xf32>, vector<1x512xf32>, vector<1x512xf32> -> vector<3x512xf32>
    %cst_16 = arith.constant 5.000000e+00 : f32
    %32 = vector.broadcast %cst_16 : f32 to vector<3x512xf32>
    %33 = arith.mulf %32, %31 : vector<3x512xf32>
    %34 = math.tanh %33 : vector<3x512xf32>
    %cst_17 = arith.constant 1.000000e+00 : f32
    %35 = vector.broadcast %cst_17 : f32 to vector<3x512xf32>
    %36 = arith.addf %34, %35 : vector<3x512xf32>
    %cst_18 = arith.constant 5.000000e-01 : f32
    %37 = vector.broadcast %cst_18 : f32 to vector<3x512xf32>
    %38 = arith.mulf %37, %36 : vector<3x512xf32>
    %39 = vector.extract_strided_slice %38 {offsets = [0, 0], sizes = [1, 512], strides = [1, 1]} : vector<3x512xf32> to vector<1x512xf32>
    %40 = vector.extract_strided_slice %38 {offsets = [1, 0], sizes = [1, 512], strides = [1, 1]} : vector<3x512xf32> to vector<1x512xf32>
    %41 = vector.extract_strided_slice %38 {offsets = [2, 0], sizes = [1, 512], strides = [1, 1]} : vector<3x512xf32> to vector<1x512xf32>
    %42 = vector.extract_strided_slice %30 {offsets = [0, 0], sizes = [1, 512], strides = [1, 1]} : vector<3x512xf32> to vector<1x512xf32>
    %43 = arith.mulf %42, %39 : vector<1x512xf32>
    %cst_19 = arith.constant 0.000000e+00 : f32
    %44 = vector.broadcast %cst_19 : f32 to vector<1x512xf32>
    %45 = arith.maximumf %43, %44 : vector<1x512xf32>
    %46 = vector.extract_strided_slice %30 {offsets = [1, 0], sizes = [1, 512], strides = [1, 1]} : vector<3x512xf32> to vector<1x512xf32>
    %cst_20 = arith.constant 0.000000e+00 : f32
    %47 = vector.broadcast %cst_20 : f32 to vector<1x512xf32>
    %48 = arith.maximumf %46, %47 : vector<1x512xf32>
    %49 = vector.extract_strided_slice %30 {offsets = [2, 0], sizes = [1, 512], strides = [1, 1]} : vector<3x512xf32> to vector<1x512xf32>
    %50 = arith.mulf %40, %49 : vector<1x512xf32>
    %cst_21 = arith.constant 0.000000e+00 : f32
    %51 = vector.broadcast %cst_21 : f32 to vector<1x512xf32>
    %52 = arith.maximumf %50, %51 : vector<1x512xf32>
    %53 = vector.extract_strided_slice %22 {offsets = [3, 0], sizes = [1, 512], strides = [1, 1]} : vector<5x512xf32> to vector<1x512xf32>
    %54 = arith.mulf %41, %53 : vector<1x512xf32>
    %55 = arith.mulf %54, %6 : vector<1x512xf32>
    %56 = vector.extract_strided_slice %22 {offsets = [4, 0], sizes = [1, 512], strides = [1, 1]} : vector<5x512xf32> to vector<1x512xf32>
    %57 = arith.mulf %41, %56 : vector<1x512xf32>
    %58 = arith.subf %45, %52 : vector<1x512xf32>
    %59 = arith.addf %48, %52 : vector<1x512xf32>
    %60 = arith.subf %59, %55 : vector<1x512xf32>
    %61 = arith.subf %60, %57 : vector<1x512xf32>
    %62 = tpu.concatenate %58, %61 in 0 : vector<1x512xf32>, vector<1x512xf32> -> vector<2x512xf32>
    %c0_22 = arith.constant 0 : index
    %c0_23 = arith.constant 0 : index
    %63 = vector.load %arg7[%c0_22, %c0_23] : memref<2x512xf32, #tpu.memory_space<vmem>>, vector<2x512xf32>
    tpu.vector_store %arg7[%c0_22, %c0_23], %62 {strides = array<i32>} : memref<2x512xf32, #tpu.memory_space<vmem>>, vector<2x512xf32>,
    return
  }
  func.func @transform_0(%arg0: i32) -> (i32, i32) {
    %c0_i32 = arith.constant 0 : i32
    %c0_i32_0 = arith.constant 0 : i32
    return %c0_i32, %arg0 : i32, i32
  }
  func.func @transform_1(%arg0: i32) -> (i32, i32) {
    %c0_i32 = arith.constant 0 : i32
    %c0_i32_0 = arith.constant 0 : i32
    %c0_i32_1 = arith.constant 0 : i32
    return %c0_i32, %c0_i32_0 : i32, i32
  }
  func.func @transform_2(%arg0: i32) -> (i32, i32) {
    %c0_i32 = arith.constant 0 : i32
    %c0_i32_0 = arith.constant 0 : i32
    %c0_i32_1 = arith.constant 0 : i32
    return %c0_i32, %c0_i32_0 : i32, i32
  }
  func.func @transform_3(%arg0: i32) -> (i32, i32) {
    %c0_i32 = arith.constant 0 : i32
    %c0_i32_0 = arith.constant 0 : i32
    %c0_i32_1 = arith.constant 0 : i32
    return %c0_i32, %c0_i32_0 : i32, i32
  }
  func.func @transform_4(%arg0: i32) -> (i32, i32) {
    %c0_i32 = arith.constant 0 : i32
    %c0_i32_0 = arith.constant 0 : i32
    %c0_i32_1 = arith.constant 0 : i32
    return %c0_i32, %c0_i32_0 : i32, i32
  }
  func.func @transform_5(%arg0: i32) -> (i32, i32) {
    %c0_i32 = arith.constant 0 : i32
    %c0_i32_0 = arith.constant 0 : i32
    %c0_i32_1 = arith.constant 0 : i32
    return %c0_i32, %c0_i32_0 : i32, i32
  }
  func.func @transform_6(%arg0: i32) -> (i32, i32) {
    %c0_i32 = arith.constant 0 : i32
    %c0_i32_0 = arith.constant 0 : i32
    return %c0_i32, %arg0 : i32, i32
  }
}

</mosaic_0001>

<bundles_post_ra>
// kernel: exphydro_ode_rhs_stacked.1
= control target key start
LH: loop header
LB: loop body
LE: loop exit
PB: predicated region body
PF: predicated region fallthrough
CT: control target
= control target key end

     0   :  { %vm59_vm0 = vcmask 1044480   ;;  %v1020_v2 = vmov 0.0   ;;  %vm46_vm1 = vcmask 39936   ;;  %s1192_s0 = inlined_call_operand.vmem [shape: f32[6,512], index: 0, kind: input, shape index: {}]   ;;  %s1193_s1 = inlined_call_operand.vmem [shape: f32[32,5], index: 1, kind: input, shape index: {}]   ;;  %s1194_s2 = inlined_call_operand.vmem [shape: f32[32,32], index: 2, kind: input, shape index: {}]   ;;  %s1195_s3 = inlined_call_operand.vmem [shape: f32[32,1], index: 3, kind: input, shape index: {}]   ;;  %s1196_s4 = inlined_call_operand.vmem [shape: f32[5,32], index: 4, kind: input, shape index: {}]   ;;  %s1197_s5 = inlined_call_operand.vmem [shape: f32[5,1], index: 5, kind: input, shape index: {}]   ;;  %s1198_s6 = inlined_call_operand.hbm [shape: f32[2,512], index: 6, kind: output, shape index: {}]  }
   0x1   :  { %v1062_v0 = vld [vmem:[%s1192_s0 + $0x8] sm:$0x3f]  ;;  %v1068_v1 = vld [vmem:[%s1192_s0 + $0x18] sm:$0x3f]  ;;  %136 = vmatprep.mubr.f32.mxu0 %v1020_v2  ;;  %v32_v3 = vld [vmem:[%s1193_s1] sm:$0xff]  ;;  %225 = vmatprep.mubr.f32.mxu1 %v1020_v2 }
   0x2   :  { %882 = vmatprep.subr.msk.mxu0 %vm59_vm0, %v1062_v0  ;;  %888 = vmatprep.subr.msk.mxu1 %vm59_vm0, %v1068_v1  ;;  %v1078_v4 = vld [vmem:[%s1192_s0] sm:$0x3f]  ;;  %v1085_v5 = vld [vmem:[%s1192_s0 + $0x10] sm:$0x3f]  ;;  %v33_v6 = vld [vmem:[%s1193_s1 + $0x8] sm:$0xff] }
   0x3   :  { %883 = vmatpush1.msk.msra.mxu0 %vm59_vm0, %v1078_v4  ;;  %889 = vmatpush1.msk.msra.mxu1 %vm59_vm0, %v1085_v5 }
   0x4   :  { %884 = vmatmul.mubr.msk.f32.vlgmr.msra.gmra.mxu0 %vm46_vm1, %v32_v3  ;;  %890 = vmatmul.mubr.msk.f32.vlgmr.msra.gmra.mxu1 %vm46_vm1, %v32_v3 }
   0x5   :  { %142 = vmatprep.mubr.f32.mxu0 %v1020_v2 }
   0x6   :  { %11 = vsyncpa [#allocation3], 0  ;;  %231 = vmatprep.mubr.f32.mxu1 %v1020_v2  ;;  %v34_v7 = vld [vmem:[%s1193_s1 + $0x10] sm:$0xff]  ;;  %v35_v8 = vld [vmem:[%s1193_s1 + $0x18] sm:$0xff]  ;;  %v1021_v11 = vmov 0   ;;  %vm286_vm2 = vcmask 261120  }
   0x7   :  { %v41_v9 = vld [vmem:[%s1195_s3 + $0x8] sm:$0xff]  ;;  %v43_v10 = vld [vmem:[%s1195_s3 + $0x18] sm:$0xff]  ;;  %909 = vset.pattern.permute.xlu1 %v1021_v11  ;;  %908 = vset.pattern.permute.xlu0 %v1021_v11  ;;  %v40_v12 = vld [vmem:[%s1195_s3] sm:$0xff]  ;;  %vm691_vm3 = vcmask 1040384   ;;  %vm696_vm4 = vcmask 1041408  }
   0x8   :  { %885 = vmatmul.mubr.msk.f32.gmra.mxu0 %vm46_vm1, %v33_v6  ;;  %891 = vmatmul.mubr.msk.f32.gmra.mxu1 %vm46_vm1, %v33_v6  ;;  %v42_v13 = vld [vmem:[%s1195_s3 + $0x10] sm:$0xff]  ;;  %v45_v14 = vld [vmem:[%s1197_s5] sm:$0x1f]  ;;  %v37_v48 = vld [vmem:[%s1194_s2 + $0x8] sm:$0xff] }
   0x9   :  { %148 = vmatprep.mubr.f32.mxu0 %v1020_v2  ;;  %237 = vmatprep.mubr.f32.mxu1 %v1020_v2  ;;  %v36_v45 = vld [vmem:[%s1194_s2] sm:$0xff]  ;;  %v38_v49 = vld [vmem:[%s1194_s2 + $0x10] sm:$0xff]  ;;  %v39_v50 = vld [vmem:[%s1194_s2 + $0x18] sm:$0xff] }
   0xa   :  { %273 = vperm.xlu1 %909, %v41_v9   ;;  %283 = vperm.xlu0 %908, %v43_v10  }
   0xc   :  { %886 = vmatmul.mubr.msk.f32.gmra.mxu0 %vm46_vm1, %v34_v7  ;;  %892 = vmatmul.mubr.msk.f32.gmra.mxu1 %vm46_vm1, %v34_v7 }
   0xd   :  { %154 = vmatprep.mubr.f32.mxu0 %v1020_v2  ;;  %243 = vmatprep.mubr.f32.mxu1 %v1020_v2 }
   0xe   :  { %268 = vperm.xlu1 %909, %v40_v12   ;;  %278 = vperm.xlu0 %908, %v42_v13  }
  0x10   :  { %887 = vmatmul.mubr.msk.f32.gmra.mxu0 %vm46_vm1, %v35_v8  ;;  %893 = vmatmul.mubr.msk.f32.gmra.mxu1 %vm46_vm1, %v35_v8 }
  0x11   :  { %363 = vmatprep.mubr.f32.mxu0 %v1020_v2  ;;  %452 = vmatprep.mubr.f32.mxu1 %v1020_v2 }
  0x12   :  { %495 = vperm.xlu0 %908, %v45_v14  }
  0x85   :  { %v274_v51 = vpop.permute.xlu1 %273  ;;  %v284_v54 = vpop.permute.xlu0 %283 }
  0x89   :  { %v269_v56 = vpop.permute.xlu1 %268  ;;  %v279_v3 = vpop.permute.xlu0 %278 }
  0xc4   :  { %v138_v15 = vpop.f32.mrf.mxu0  ;;  %v227_v16 = vpop.f32.mrf.mxu1 }
  0xc5   :  { %910 = vtanh.f32 %v138_v15 }
  0xc6   :  { %v140_v17 = vpop.f32.mrf.mxu0  ;;  %v229_v18 = vpop.f32.mrf.mxu1 }
  0xc7   :  { %912 = vtanh.f32 %v140_v17 }
  0xc8   :  { %v144_v19 = vpop.f32.mrf.mxu0  ;;  %v233_v20 = vpop.f32.mrf.mxu1 }
  0xc9   :  { %914 = vtanh.f32 %v144_v19 }
  0xca   :  { %v146_v21 = vpop.f32.mrf.mxu0  ;;  %v235_v22 = vpop.f32.mrf.mxu1 }
  0xcb   :  { %916 = vtanh.f32 %v146_v21 }
  0xcc   :  { %v150_v23 = vpop.f32.mrf.mxu0  ;;  %v239_v24 = vpop.f32.mrf.mxu1 }
  0xcd   :  { %918 = vtanh.f32 %v150_v23 }
  0xce   :  { %v152_v25 = vpop.f32.mrf.mxu0  ;;  %v241_v26 = vpop.f32.mrf.mxu1 }
  0xcf   :  { %920 = vtanh.f32 %v152_v25 }
  0xd0   :  { %v156_v27 = vpop.f32.mrf.mxu0  ;;  %v245_v28 = vpop.f32.mrf.mxu1 }
  0xd1   :  { %922 = vtanh.f32 %v156_v27 }
  0xd2   :  { %v158_v29 = vpop.f32.mrf.mxu0  ;;  %v247_v30 = vpop.f32.mrf.mxu1 }
  0xd3   :  { %924 = vtanh.f32 %v158_v29  ;;  %v911_v31 = vpop.eup %910 }
  0xd4   :  { %926 = vtanh.f32 %v247_v30  ;;  %v913_v32 = vpop.eup %912 }
  0xd5   :  { %928 = vtanh.f32 %v245_v28 }
  0xd6   :  { %930 = vtanh.f32 %v241_v26  ;;  %v915_v33 = vpop.eup %914 }
  0xd7   :  { %932 = vtanh.f32 %v239_v24 }
  0xd8   :  { %934 = vtanh.f32 %v235_v22  ;;  %v917_v34 = vpop.eup %916 }
  0xd9   :  { %936 = vtanh.f32 %v233_v20 }
  0xda   :  { %938 = vtanh.f32 %v229_v18  ;;  %v919_v35 = vpop.eup %918 }
  0xdb   :  { %940 = vtanh.f32 %v227_v16 }
  0xdc   :  { %v921_v36 = vpop.eup %920 }
  0xde   :  { %v923_v37 = vpop.eup %922 }
  0xe0   :  { %v925_v38 = vpop.eup %924 }
  0xe1   :  { %v927_v39 = vpop.eup %926  ;;  %323 = vmatprep.subr.mxu0 %v925_v38 }
  0xe2   :  { %v929_v40 = vpop.eup %928  ;;  %412 = vmatprep.subr.mxu1 %v927_v39  ;;  %324 = vmatpush1.msra.mxu0 %v923_v37 }
  0xe3   :  { %v931_v41 = vpop.eup %930  ;;  %413 = vmatpush1.msra.mxu1 %v929_v40  ;;  %325 = vmatprep.subr.mxu0 %v921_v36 }
  0xe4   :  { %v933_v42 = vpop.eup %932  ;;  %414 = vmatprep.subr.mxu1 %v931_v41  ;;  %326 = vmatpush1.msra.mxu0 %v919_v35  ;;  %v44_v41 = vld [vmem:[%s1196_s4] sm:$0x1f]  ;;  %s1023_s4 = smov [#allocation2]  }
  0xe5   :  { %v935_v43 = vpop.eup %934  ;;  %415 = vmatpush1.msra.mxu1 %v933_v42  ;;  %327 = vmatprep.subr.mxu0 %v917_v34  ;;  %s874_s28 = sshll.u32 %s1023_s4, 4  ;;  %s875_s28 = int_to_ptr.vmem [resolvable:$true] %s874_s28 }
  0xe6   :  { %v937_v44 = vpop.eup %936  ;;  %416 = vmatprep.subr.mxu1 %v935_v43  ;;  %328 = vmatpush1.msra.mxu0 %v915_v33  ;;  %s998_s29 = scalar_lea.vmem %s875_s28, 128  ;;  %p1003_p1 = scmp.lt.s32.totalorder %s875_s28, %s875_s28 }
  0xe7   :  { %v939_v46 = vpop.eup %938  ;;  %417 = vmatpush1.msra.mxu1 %v937_v44  ;;  %329 = vmatprep.subr.mxu0 %v913_v32  ;;  %v28_v44 = vsub.f32 0.0, %v1078_v4  ;;  %p999_p0 = scmp.ne.s32.totalorder %s875_s28, %s998_s29  ;;  %p1004_p2 = scmp.lt.s32.totalorder %s998_s29, %s998_s29 }
  0xe8   :  { %v941_v47 = vpop.eup %940  ;;  %418 = vmatprep.subr.mxu1 %v939_v46  ;;  %330 = vmatpush1.msra.mxu0 %v911_v31  ;;  %v29_v46 = vsub.f32 0.0, %v1062_v0 }
  0xe9   :  { %419 = vmatpush1.msra.mxu1 %v941_v47  ;;  %894 = vmatmul.mubr.msk.f32.vlgmr.msra.gmra.mxu0 %vm286_vm2, %v36_v45  ;;  %v675_v47 = vrot.slane %v28_v44, 3  ;;  %v854_v44 = vlaneseq  ;;  %p1005_p3 = por %p1004_p2, %p1003_p1 }
  0xea   :  { %898 = vmatmul.mubr.msk.f32.vlgmr.msra.gmra.mxu1 %vm286_vm2, %v36_v45  ;;  %369 = vmatprep.mubr.f32.mxu0 %v1020_v2  ;;  %v30_v45 = vsub.f32 0.0, %v1085_v5 }
  0xeb   :  { %458 = vmatprep.mubr.f32.mxu1 %v1020_v2  ;;  %p1006_p4 = pnand %p1005_p3, %p999_p0 }
  0xed   :  { %895 = vmatmul.mubr.msk.f32.gmra.mxu0 %vm286_vm2, %v37_v48 }
  0xee   :  { %899 = vmatmul.mubr.msk.f32.gmra.mxu1 %vm286_vm2, %v37_v48  ;;  %375 = vmatprep.mubr.f32.mxu0 %v1020_v2  ;;  %v683_v48 = vrot.slane %v1078_v4, 7 }
  0xef   :  { %464 = vmatprep.mubr.f32.mxu1 %v1020_v2 }
  0xf1   :  { %896 = vmatmul.mubr.msk.f32.gmra.mxu0 %vm286_vm2, %v38_v49 }
  0xf2   :  { %900 = vmatmul.mubr.msk.f32.gmra.mxu1 %vm286_vm2, %v38_v49  ;;  %381 = vmatprep.mubr.f32.mxu0 %v1020_v2  ;;  %v31_v49 = vsub.f32 0.0, %v1068_v1 }
  0xf3   :  { %470 = vmatprep.mubr.f32.mxu1 %v1020_v2 }
  0xf5   :  { %897 = vmatmul.mubr.msk.f32.gmra.mxu0 %vm286_vm2, %v39_v50 }
  0xf6   :  { %901 = vmatmul.mubr.msk.f32.gmra.mxu1 %vm286_vm2, %v39_v50  ;;  %565 = vmatprep.mubr.f32.mxu0 %v1020_v2  ;;  %v677_v50 = vrot.slane %v30_v45, 3 }
  0xf7   :  { %636 = vmatprep.mubr.f32.mxu1 %v1020_v2 }
 0x1a9   :  { %v365_v52 = vpop.f32.mrf.mxu0 }
 0x1aa   :  { %v454_v53 = vpop.f32.mrf.mxu1  ;;  %v366_v60 = vadd.f32 %v365_v52, %v269_v56  ;;  %v676_v52 = vrot.slane %v29_v46, 3  ;;  %v766_v46 = vrot.slane %v1062_v0, 3 }
 0x1ab   :  { %v367_v55 = vpop.f32.mrf.mxu0  ;;  %v455_v26 = vadd.f32 %v454_v53, %v269_v56  ;;  %v684_v53 = vrot.slane %v1062_v0, 7 }
 0x1ac   :  { %v456_v57 = vpop.f32.mrf.mxu1  ;;  %v368_v62 = vadd.f32 %v367_v55, %v269_v56  ;;  %942 = vtanh.f32 %v366_v60  ;;  %v678_v55 = vrot.slane %v31_v49, 3 }
 0x1ad   :  { %v371_v58 = vpop.f32.mrf.mxu0  ;;  %v457_v25 = vadd.f32 %v456_v57, %v269_v56  ;;  %v686_v56 = vrot.slane %v1068_v1, 7 }
 0x1ae   :  { %v460_v59 = vpop.f32.mrf.mxu1  ;;  %v372_v6 = vadd.f32 %v371_v58, %v274_v51  ;;  %944 = vtanh.f32 %v368_v62 }
 0x1af   :  { %v373_v61 = vpop.f32.mrf.mxu0  ;;  %v461_v24 = vadd.f32 %v460_v59, %v274_v51  ;;  %v693_v59 = vsel %vm691_vm3, %v676_v52, %v684_v53  ;;  %v695_v60 = vsel %vm691_vm3, %v678_v55, %v686_v56 }
 0x1b0   :  { %v462_v63 = vpop.f32.mrf.mxu1  ;;  %v374_v8 = vadd.f32 %v373_v61, %v274_v51  ;;  %946 = vtanh.f32 %v372_v6 }
 0x1b1   :  { %v377_v7 = vpop.f32.mrf.mxu0  ;;  %v463_v23 = vadd.f32 %v462_v63, %v274_v51  ;;  %v685_v51 = vrot.slane %v1085_v5, 7  ;;  %v698_v63 = vsel %vm696_vm4, %v693_v59, %v684_v53 }
 0x1b2   :  { %v466_v9 = vpop.f32.mrf.mxu1  ;;  %v378_v2 = vadd.f32 %v377_v7, %v279_v3  ;;  %948 = vtanh.f32 %v374_v8  ;;  %v702_v7 = vmul.f32 5.0, %v698_v63 }
 0x1b3   :  { %v379_v10 = vpop.f32.mrf.mxu0  ;;  %v467_v22 = vadd.f32 %v466_v9, %v279_v3  ;;  %v694_v57 = vsel %vm691_vm3, %v677_v50, %v685_v51  ;;  %v496_v9 = vpop.permute.xlu0 %495 }
 0x1b4   :  { %v380_v11 = vadd.f32 %v379_v10, %v279_v3  ;;  %v468_v12 = vpop.f32.mrf.mxu1  ;;  %950 = vtanh.f32 %v378_v2  ;;  %v699_v61 = vsel %vm696_vm4, %v694_v57, %v685_v51  ;;  %v765_v51 = vrot.slane %v1078_v4, 3 }
 0x1b5   :  { %v383_v13 = vpop.f32.mrf.mxu0  ;;  %v469_v20 = vadd.f32 %v468_v12, %v279_v3  ;;  %v700_v3 = vsel %vm696_vm4, %v695_v60, %v686_v56  ;;  %v703_v6 = vmul.f32 5.0, %v699_v61 }
 0x1b6   :  { %v384_v14 = vadd.f32 %v383_v13, %v284_v54  ;;  %v472_v15 = vpop.f32.mrf.mxu1  ;;  %952 = vtanh.f32 %v380_v11  ;;  %v704_v8 = vmul.f32 5.0, %v700_v3 }
 0x1b7   :  { %v385_v16 = vpop.f32.mrf.mxu0  ;;  %v473_v17 = vadd.f32 %v472_v15, %v284_v54 }
 0x1b8   :  { %v386_v18 = vadd.f32 %v385_v16, %v284_v54  ;;  %v474_v19 = vpop.f32.mrf.mxu1  ;;  %954 = vtanh.f32 %v384_v14 }
 0x1b9   :  { %v475_v21 = vadd.f32 %v474_v19, %v284_v54  ;;  %v943_v27 = vpop.eup %942  ;;  %v692_v54 = vsel %vm691_vm3, %v675_v47, %v683_v48  ;;  %v768_v47 = vrot.slane %v1068_v1, 3  ;;  %v1180_v1 = vshrl.u32 %v854_v44, 7 }
 0x1ba   :  { %956 = vtanh.f32 %v386_v18  ;;  %v697_v58 = vsel %vm696_vm4, %v692_v54, %v683_v48 }
 0x1bb   :  { %958 = vtanh.f32 %v475_v21  ;;  %v945_v28 = vpop.eup %944  ;;  %v701_v62 = vmul.f32 5.0, %v697_v58  ;;  %v767_v58 = vrot.slane %v1085_v5, 3 }
 0x1bc   :  { %960 = vtanh.f32 %v473_v17 }
 0x1bd   :  { %962 = vtanh.f32 %v469_v20  ;;  %v947_v29 = vpop.eup %946 }
 0x1be   :  { %964 = vtanh.f32 %v467_v22 }
 0x1bf   :  { %966 = vtanh.f32 %v463_v23  ;;  %v949_v30 = vpop.eup %948 }
 0x1c0   :  { %968 = vtanh.f32 %v461_v24 }
 0x1c1   :  { %970 = vtanh.f32 %v457_v25  ;;  %v951_v31 = vpop.eup %950 }
 0x1c2   :  { %972 = vtanh.f32 %v455_v26 }
 0x1c3   :  { %v953_v32 = vpop.eup %952  ;;  %974 = vtanh.f32 %v701_v62 }
 0x1c4   :  { %976 = vtanh.f32 %v703_v6 }
 0x1c5   :  { %v955_v33 = vpop.eup %954  ;;  %978 = vtanh.f32 %v702_v7 }
 0x1c6   :  { %980 = vtanh.f32 %v704_v8 }
 0x1c7   :  { %v957_v34 = vpop.eup %956 }
 0x1c8   :  { %v959_v35 = vpop.eup %958  ;;  %525 = vmatprep.subr.mxu0 %v957_v34 }
 0x1c9   :  { %v961_v36 = vpop.eup %960  ;;  %596 = vmatprep.subr.mxu1 %v959_v35  ;;  %526 = vmatpush1.msra.mxu0 %v955_v33 }
 0x1ca   :  { %v963_v37 = vpop.eup %962  ;;  %597 = vmatpush1.msra.mxu1 %v961_v36  ;;  %527 = vmatprep.subr.mxu0 %v953_v32 }
 0x1cb   :  { %v965_v38 = vpop.eup %964  ;;  %598 = vmatprep.subr.mxu1 %v963_v37  ;;  %528 = vmatpush1.msra.mxu0 %v951_v31 }
 0x1cc   :  { %v967_v39 = vpop.eup %966  ;;  %599 = vmatpush1.msra.mxu1 %v965_v38  ;;  %529 = vmatprep.subr.mxu0 %v949_v30 }
 0x1cd   :  { %v969_v40 = vpop.eup %968  ;;  %600 = vmatprep.subr.mxu1 %v967_v39  ;;  %530 = vmatpush1.msra.mxu0 %v947_v29 }
 0x1ce   :  { %v971_v42 = vpop.eup %970  ;;  %601 = vmatpush1.msra.mxu1 %v969_v40  ;;  %531 = vmatprep.subr.mxu0 %v945_v28 }
 0x1cf   :  { %v973_v43 = vpop.eup %972  ;;  %602 = vmatprep.subr.mxu1 %v971_v42  ;;  %532 = vmatpush1.msra.mxu0 %v943_v27  ;;  %v1022_v42 = vmov 1983009808  }
 0x1d0   :  { %603 = vmatpush1.msra.mxu1 %v973_v43  ;;  %902 = vmatmul.mubr.msk.f32.vlgmr.msra.gmra.mxu0 %vm286_vm2, %v44_v41  ;;  %v975_v29 = vpop.eup %974  ;;  %v1173_v43 = vunpack.c.l.s4 %v1022_v42 }
 0x1d1   :  { %903 = vmatmul.mubr.msk.f32.vlgmr.msra.gmra.mxu1 %vm286_vm2, %v44_v41  ;;  %v977_v30 = vpop.eup %976  ;;  %v709_v31 = vadd.f32 1.0, %v975_v29 }
 0x1d2   :  { %v979_v32 = vpop.eup %978  ;;  %v711_v34 = vadd.f32 1.0, %v977_v30  ;;  %v853_v0 = vunpack.c.0.s8 %v1173_v43 }
 0x1d3   :  { %v981_v33 = vpop.eup %980  ;;  %v713_v35 = vmul.f32 0.5, %v709_v31  ;;  %v710_v37 = vadd.f32 1.0, %v979_v32 }
 0x1d4   :  { %v712_v38 = vadd.f32 1.0, %v981_v33  ;;  %v715_v40 = vmul.f32 0.5, %v711_v34 }
 0x1d5   :  { %v714_v56 = vmul.f32 0.5, %v710_v37 }
 0x1d6   :  { %v716_v57 = vmul.f32 0.5, %v712_v38 }
 0x290   :  { %v567_v2 = vpop.f32.mrf.mxu0 }
 0x291   :  { %v568_v10 = vadd.f32 %v567_v2, %v496_v9  ;;  %v638_v11 = vpop.f32.mrf.mxu1 }
 0x292   :  { %v639_v12 = vadd.f32 %v638_v11, %v496_v9  ;;  %v569_v13 = vpop.f32.mrf.mxu0 }
 0x293   :  { %v643_v14 = vmul.f32 1.442695, %v568_v10  ;;  %v651_v15 = vsub.f32 0.0, %v568_v10  ;;  %v570_v16 = vadd.f32 %v569_v13, %v496_v9  ;;  %v640_v17 = vpop.f32.mrf.mxu1 }
 0x294   :  { %v647_v18 = vmul.f32 1.442695, %v639_v12  ;;  %v653_v19 = vsub.f32 0.0, %v639_v12  ;;  %v641_v20 = vadd.f32 %v640_v17, %v496_v9 }
 0x295   :  { %982 = vpow2.f32 %v643_v14  ;;  %v655_v21 = vmul.f32 1.442695, %v651_v15  ;;  %v645_v22 = vmul.f32 1.442695, %v570_v16  ;;  %v652_v23 = vsub.f32 0.0, %v570_v16 }
 0x296   :  { %984 = vpow2.f32 %v647_v18  ;;  %v659_v24 = vmul.f32 1.442695, %v653_v19  ;;  %v654_v25 = vsub.f32 0.0, %v641_v20  ;;  %v649_v27 = vmul.f32 1.442695, %v641_v20 }
 0x297   :  { %986 = vpow2.f32 %v655_v21  ;;  %v657_v26 = vmul.f32 1.442695, %v652_v23 }
 0x298   :  { %988 = vpow2.f32 %v659_v24  ;;  %v661_v28 = vmul.f32 1.442695, %v654_v25 }
 0x299   :  { %990 = vpow2.f32 %v645_v22 }
 0x29a   :  { %992 = vpow2.f32 %v657_v26 }
 0x29b   :  { %994 = vpow2.f32 %v649_v27 }
 0x29c   :  { %996 = vpow2.f32 %v661_v28 }
 0x2a2   :  { %v983_v36 = vpop.eup %982 }
 0x2a3   :  { %v985_v39 = vpop.eup %984  ;;  %v753_v41 = vrot.slane %v983_v36, 1  ;;  %v777_v49 = vrot.slane %v983_v36, 2 }
 0x2a4   :  { %v987_v45 = vpop.eup %986  ;;  %v755_v48 = vrot.slane %v985_v39, 1  ;;  %v779_v54 = vrot.slane %v985_v39, 2 }
 0x2a5   :  { %v989_v50 = vpop.eup %988  ;;  %v663_v52 = vsub.f32 %v983_v36, %v987_v45  ;;  %v761_v53 = vmul.f32 %v753_v41, %v713_v35  ;;  %v785_v7 = vmul.f32 %v777_v49, %v713_v35 }
 0x2a6   :  { %v991_v55 = vpop.eup %990  ;;  %v665_v59 = vsub.f32 %v985_v39, %v989_v50  ;;  %v763_v62 = vmul.f32 %v755_v48, %v715_v40  ;;  %v787_v11 = vmul.f32 %v779_v54, %v715_v40 }
 0x2a7   :  { %v993_v60 = vpop.eup %992  ;;  %v667_v61 = vmul.f32 0.5, %v663_v52  ;;  %v754_v4 = vrot.slane %v991_v55, 1  ;;  %v773_v10 = vmul.f32 %v765_v51, %v761_v53  ;;  %v778_v14 = vrot.slane %v991_v55, 2 }
 0x2a8   :  { %v995_v63 = vpop.eup %994  ;;  %v669_v3 = vmul.f32 0.5, %v665_v59  ;;  %v664_v6 = vsub.f32 %v991_v55, %v993_v60  ;;  %v775_v18 = vmul.f32 %v767_v58, %v763_v62  ;;  %v829_v22 = vrot.slane %v785_v7, 1 }
 0x2a9   :  { %v997_v8 = vpop.eup %996  ;;  %v733_v9 = vrot.slane %v667_v61, 1  ;;  %v756_v2 = vrot.slane %v995_v63, 1  ;;  %v717_v13 = vmul.f32 %v713_v35, %v667_v61  ;;  %v762_v21 = vmul.f32 %v754_v4, %v714_v56 }
 0x2aa   :  { %v668_v12 = vmul.f32 0.5, %v664_v6  ;;  %v666_v5 = vsub.f32 %v995_v63, %v997_v8  ;;  %v719_v15 = vmul.f32 %v715_v40, %v669_v3  ;;  %v735_v16 = vrot.slane %v669_v3, 1 }
 0x2ab   :  { %v741_v17 = vmul.f32 %v733_v9, %v713_v35  ;;  %v764_v26 = vmul.f32 %v756_v2, %v716_v57  ;;  %v721_v27 = vmax.f32 %v717_v13, 0.0  ;;  %v725_v28 = vmax.f32 %v667_v61, 0.0 }
 0x2ac   :  { %v670_v19 = vmul.f32 0.5, %v666_v5  ;;  %v718_v20 = vmul.f32 %v714_v56, %v668_v12  ;;  %v734_v23 = vrot.slane %v668_v12, 1  ;;  %v743_v24 = vmul.f32 %v735_v16, %v715_v40 }
 0x2ad   :  { %v745_v25 = vmax.f32 %v741_v17, 0.0  ;;  %v727_v29 = vmax.f32 %v669_v3, 0.0  ;;  %v723_v31 = vmax.f32 %v719_v15, 0.0  ;;  %v726_v32 = vmax.f32 %v668_v12, 0.0 }
 0x2ae   :  { %v736_v30 = vrot.slane %v670_v19, 1  ;;  %v742_v33 = vmul.f32 %v734_v23, %v714_v56  ;;  %v747_v34 = vmax.f32 %v743_v24, 0.0  ;;  %v720_v36 = vmul.f32 %v716_v57, %v670_v19 }
 0x2af   :  { %v774_v35 = vmul.f32 %v766_v46, %v762_v21  ;;  %v780_v38 = vrot.slane %v995_v63, 2  ;;  %v722_v39 = vmax.f32 %v718_v20, 0.0  ;;  %v776_v42 = vmul.f32 %v768_v47, %v764_v26 }
 0x2b0   :  { %v744_v37 = vmul.f32 %v736_v30, %v716_v57  ;;  %v746_v41 = vmax.f32 %v742_v33, 0.0  ;;  %v805_v44 = vadd.f32 %v745_v25, %v725_v28  ;;  %v728_v45 = vmax.f32 %v670_v19, 0.0 }
 0x2b1   :  { %v786_v48 = vmul.f32 %v778_v14, %v714_v56  ;;  %v807_v49 = vadd.f32 %v747_v34, %v727_v29  ;;  %v788_v50 = vmul.f32 %v780_v38, %v716_v57  ;;  %v793_v51 = vrot.slane %v745_v25, 1 }
 0x2b2   :  { %v748_v40 = vmax.f32 %v744_v37, 0.0  ;;  %v806_v52 = vadd.f32 %v746_v41, %v726_v32  ;;  %v813_v53 = vrot.slane %v773_v10, 1  ;;  %v794_v54 = vrot.slane %v746_v41, 1 }
 0x2b3   :  { %v814_v58 = vrot.slane %v774_v35, 1  ;;  %v815_v59 = vrot.slane %v775_v18, 1  ;;  %v795_v60 = vrot.slane %v747_v34, 1  ;;  %v816_v46 = vrot.slane %v776_v42, 1 }
 0x2b4   :  { %v808_v55 = vadd.f32 %v748_v40, %v728_v45  ;;  %v796_v61 = vrot.slane %v748_v40, 1  ;;  %v821_v62 = vsub.f32 %v805_v44, %v813_v53  ;;  %v830_v47 = vrot.slane %v786_v48, 1 }
 0x2b5   :  { %v822_v63 = vsub.f32 %v806_v52, %v814_v58  ;;  %v823_v3 = vsub.f32 %v807_v49, %v815_v59  ;;  %v831_v6 = vrot.slane %v787_v11, 1  ;;  %v724_v4 = vmax.f32 %v720_v36, 0.0 }
 0x2b6   :  { %v824_v7 = vsub.f32 %v808_v55, %v816_v46  ;;  %v832_v56 = vrot.slane %v788_v50, 1  ;;  %v837_v8 = vsub.f32 %v821_v62, %v829_v22  ;;  %v801_v57 = vsub.f32 %v721_v27, %v793_v51 }
 0x2b7   :  { %v802_v9 = vsub.f32 %v722_v39, %v794_v54  ;;  %v838_v2 = vsub.f32 %v822_v63, %v830_v47  ;;  %v839_v10 = vsub.f32 %v823_v3, %v831_v6  ;;  %v803_v12 = vsub.f32 %v723_v31, %v795_v60 }
 0x2b8   :  { %v804_v5 = vsub.f32 %v724_v4, %v796_v61  ;;  %v840_v13 = vsub.f32 %v824_v7, %v832_v56  ;;  %v856_v14 = vsub.s32 %v853_v0, %v1180_v1  ;;  %v841_v15 = vsel %vm691_vm3, %v801_v57, %v837_v8 }
 0x2b9   :  { %v842_v16 = vsel %vm691_vm3, %v802_v9, %v838_v2  ;;  %v843_v11 = vsel %vm691_vm3, %v803_v12, %v839_v10 }
 0x2ba   :  { %v844_v17 = vsel %vm691_vm3, %v804_v5, %v840_v13  ;;  %v849_v18 = vcombine.low %v841_v15, %v842_v16 }
 0x2bb   :  { %v850_v19 = vcombine.low %v843_v11, %v844_v17 }
 0x2bc   :  { %v857_v20 = vrot.slane %v849_v18, %v856_v14 }
 0x2bd   :  { %v864_v21 = vrot.slane %v850_v19, %v856_v14 }
 0x2bf   :  { %v865_v22 = vcombine.low %v857_v20, %v864_v21 }
 0x2c1   :  { %867 = vst [vmem:[#allocation2] sm:$0xff] %v865_v22 }
 0x2c2   :  { %1009 = shalt.err (!%p1006_p4)
}
 0x2c3   :  { %877 = dma.vmem_to_hbm [thread:$0]  %s875_s28, 128, %s1198_s6, [#allocation3]  }
 0x2c4   :  { %1018 = dma.done.wait [#allocation3], 128  }
 0x2c5   :  { %1019 = vsyncadd [#allocation3], 4294967168 }
 0x2c6   :  { %881 = vsyncpa [#allocation3], 1 }

</bundles_post_ra>
